<compile_context>
chip_gen: v7x
topology: tpu7x:2x2x1
jax: 0.10.0
libtpu: 0.0.40
codegen_flags: <defaults>
</compile_context>

<pallas_src>
import jax
import jax.numpy as jnp
from jax import lax
from jax.experimental import pallas as pl
from jax.experimental.pallas import tpu as pltpu


LEAKY_SLOPE = 0.01   # nn.LeakyReLU default negative_slope
LN_EPS = 1e-5        # nn.LayerNorm default eps


def residual_block_kernel(x_ref, w1_ref, b1_ref, gamma_ref, beta_ref,
                          w2_ref, b2_ref, o_ref):
    """One (tile_b, F) batch tile.  Weights/params are fully resident in VMEM."""
    mm_dtype = w1_ref.dtype                    # bf16 (default) or f32
    x_f32 = x_ref[...].astype(jnp.float32)     # kept f32 for the residual add

    # Linear 1 (MXU): narrow inputs, f32 accumulation.
    h = jnp.dot(x_ref[...].astype(mm_dtype), w1_ref[...],
                preferred_element_type=jnp.float32) + b1_ref[...]

    # LayerNorm over features (biased variance, eps inside rsqrt) -- all f32 (VPU/EUP).
    mean = jnp.mean(h, axis=-1, keepdims=True)
    centered = h - mean
    var = jnp.mean(centered * centered, axis=-1, keepdims=True)
    h_norm = centered * lax.rsqrt(var + LN_EPS)
    h_norm = h_norm * gamma_ref[...] + beta_ref[...]

    # LeakyReLU (VPU elementwise).
    h_act = jnp.where(h_norm >= 0.0, h_norm, LEAKY_SLOPE * h_norm)

    # Linear 2 (MXU) + residual.
    y = jnp.dot(h_act.astype(mm_dtype), w2_ref[...],
                preferred_element_type=jnp.float32) + b2_ref[...]
    o_ref[...] = (x_f32 + y).astype(o_ref.dtype)


def _choose_tile_b(B: int) -> int:
    """Batch tile: multiple of 8 (f32 sublanes), capped at 256 so large batches
    produce a multi-step grid (pipelining + v7x megacore sharding)."""
    if B <= 8:
        return B                      # tiny batch: single full-extent block
    return min(256, ((B + 7) // 8) * 8)


def _build_call(B_pad, F, tile_b, x_dtype, matmul_dtype, single_buffer_weights):
    grid = (B_pad // tile_b,)
    x_spec = pl.BlockSpec((tile_b, F), lambda i: (i, 0))
    vec_spec = pl.BlockSpec((1, F), lambda i: (0, 0))

    if single_buffer_weights:
        # Constant index_map -> one buffer is enough; the second buffer is pure VMEM
        # waste (biggest win on v7x's 64 MiB VMEM).
        w_spec = pl.BlockSpec((F, F), lambda i: (0, 0),
                              pipeline_mode=pl.Buffered(1))
    else:
        w_spec = pl.BlockSpec((F, F), lambda i: (0, 0))

    n_wbuf = 1 if single_buffer_weights else 2
    mm_bytes = jnp.dtype(matmul_dtype).itemsize
    x_bytes = jnp.dtype(x_dtype).itemsize
    resident = (n_wbuf * 2 * F * F * mm_bytes          # W1, W2
                + 2 * 4 * F * 4                        # b1, b2, gamma, beta (dbl-buffered)
                + 2 * 2 * tile_b * F * x_bytes         # x + out tiles, dbl-buffered
                + (8 << 20))                           # compiler scratch headroom
    vmem_limit = int(min(56 << 20, max(32 << 20, resident)))

    return pl.pallas_call(
        residual_block_kernel,
        out_shape=jax.ShapeDtypeStruct((B_pad, F), x_dtype),
        grid_spec=pltpu.PrefetchScalarGridSpec(
            num_scalar_prefetch=0,
            grid=grid,
            in_specs=[x_spec, w_spec, vec_spec, vec_spec, vec_spec,
                      w_spec, vec_spec],
            out_specs=x_spec,
        ),
        compiler_params=pltpu.CompilerParams(
            dimension_semantics=("parallel",),
            vmem_limit_bytes=vmem_limit),
    )


def residual_block(x, w1, b1, gamma, beta, w2, b2, *,
                   tile_b=None, matmul_dtype=jnp.bfloat16):
    """x: (B, F).  w1, w2: (F, F) laid out as (in, out).  b/gamma/beta: (1, F)."""
    B, F = x.shape
    assert w1.shape == (F, F) and w2.shape == (F, F)

    if tile_b is None:
        tile_b = _choose_tile_b(B)
    B_pad = ((B + tile_b - 1) // tile_b) * tile_b
    x_in = x if B_pad == B else jnp.pad(x, ((0, B_pad - B), (0, 0)))

    # MXU-input dtype for the weights (bf16 default: native MXU rate on v5e/v6e/v7x,
    # half the HBM/DMA bytes and VMEM residency).
    w1c = w1.astype(matmul_dtype)
    w2c = w2.astype(matmul_dtype)

    try:
        call = _build_call(B_pad, F, tile_b, x.dtype, matmul_dtype, True)
        out = jax.block_until_ready(call(x_in, w1c, b1, gamma, beta, w2c, b2))
    except Exception:
        # Fallback for JAX builds that reject BlockSpec(pipeline_mode=...).
        call = _build_call(B_pad, F, tile_b, x.dtype, matmul_dtype, False)
        out = jax.block_until_ready(call(x_in, w1c, b1, gamma, beta, w2c, b2))

    return out[:B] if B_pad != B else out


def init_params(key, in_features):
    """Deterministic init mirroring nn.Linear's U(-1/sqrt(F), 1/sqrt(F)) and
    nn.LayerNorm's (gamma=1, beta=0)."""
    k1, k2, k3, k4 = jax.random.split(key, 4)
    bound = 1.0 / jnp.sqrt(jnp.float32(in_features))
    # Stored as (in, out) == PyTorch weight transposed.
    w1 = jax.random.uniform(k1, (in_features, in_features), jnp.float32, -bound, bound)
    b1 = jax.random.uniform(k2, (1, in_features), jnp.float32, -bound, bound)
    w2 = jax.random.uniform(k3, (in_features, in_features), jnp.float32, -bound, bound)
    b2 = jax.random.uniform(k4, (1, in_features), jnp.float32, -bound, bound)
    gamma = jnp.ones((1, in_features), jnp.float32)
    beta = jnp.zeros((1, in_features), jnp.float32)
    return w1, b1, gamma, beta, w2, b2


def residual_block_ref(x, w1, b1, gamma, beta, w2, b2):
    """Pure-JAX f32 reference (PyTorch-equivalent semantics)."""
    h = x @ w1 + b1
    mean = jnp.mean(h, axis=-1, keepdims=True)
    var = jnp.mean((h - mean) ** 2, axis=-1, keepdims=True)
    hn = (h - mean) / jnp.sqrt(var + LN_EPS) * gamma + beta
    hn = jnp.where(hn >= 0, hn, LEAKY_SLOPE * hn)
    return x + hn @ w2 + b2


if __name__ == "__main__":
    key = jax.random.PRNGKey(0)
    kx, kp, kx2, kp2 = jax.random.split(key, 4)

    # --- Small shape consistent with the module: batch=8, in_features=32. ---
    B, F = 8, 32
    x = jax.random.normal(kx, (B, F), jnp.float32)
    params = init_params(kp, F)
    ref = residual_block_ref(x, *params)

    # Exact-semantics path (f32 matmuls) -- tight tolerance.
    out_f32 = jax.block_until_ready(residual_block(x, *params, matmul_dtype=jnp.float32))
    assert out_f32.shape == (B, F) and out_f32.dtype == jnp.float32
    assert jnp.allclose(out_f32, ref, atol=1e-4, rtol=1e-4), "f32 path mismatch"

    # Fast path (bf16 MXU inputs, f32 accumulation) -- bf16-level tolerance.
    out_bf16 = jax.block_until_ready(residual_block(x, *params))
    assert jnp.allclose(out_bf16, ref, atol=5e-2, rtol=5e-2), "bf16 path mismatch"

    # --- Larger, lane/MXU-friendly shape exercising the tiled grid (grid=(2,)). ---
    B2, F2 = 512, 256
    x2 = jax.random.normal(kx2, (B2, F2), jnp.float32)
    params2 = init_params(kp2, F2)
    ref2 = residual_block_ref(x2, *params2)
    out2 = jax.block_until_ready(residual_block(x2, *params2))
    assert out2.shape == (B2, F2)
    assert jnp.allclose(out2, ref2, atol=5e-2, rtol=5e-2), "tiled bf16 path mismatch"

    print("KERNEL_OK")
</pallas_src>

<mosaic_0001>
module attributes {stable_mosaic.version = 11 : i64} {
  func.func @residual_block_kernel(%arg0: i32, %arg1: memref<8x32xf32, #tpu.memory_space<vmem>>, %arg2: memref<32x32xf32, #tpu.memory_space<vmem>>, %arg3: memref<1x32xf32, #tpu.memory_space<vmem>>, %arg4: memref<1x32xf32, #tpu.memory_space<vmem>>, %arg5: memref<1x32xf32, #tpu.memory_space<vmem>>, %arg6: memref<32x32xf32, #tpu.memory_space<vmem>>, %arg7: memref<1x32xf32, #tpu.memory_space<vmem>>, %arg8: memref<8x32xf32, #tpu.memory_space<vmem>>) attributes {dimension_semantics = [#tpu.dimension_semantics<parallel>], iteration_bounds = array<i64: 1>, scalar_prefetch = 0 : i64, scratch_operands = 0 : i64, tpu.core_type = #tpu.core_type<tc>, window_params = [{transform_indices = @transform_0, window_bounds = array<i64: 8, 32>}, {pipeline_mode = #tpu.pipeline_mode<synchronous>, transform_indices = @transform_1, window_bounds = array<i64: 32, 32>}, {pipeline_mode = #tpu.pipeline_mode<synchronous>, transform_indices = @transform_2, window_bounds = array<i64: 1, 32>}, {pipeline_mode = #tpu.pipeline_mode<synchronous>, transform_indices = @transform_3, window_bounds = array<i64: 1, 32>}, {pipeline_mode = #tpu.pipeline_mode<synchronous>, transform_indices = @transform_4, window_bounds = array<i64: 1, 32>}, {pipeline_mode = #tpu.pipeline_mode<synchronous>, transform_indices = @transform_5, window_bounds = array<i64: 32, 32>}, {pipeline_mode = #tpu.pipeline_mode<synchronous>, transform_indices = @transform_6, window_bounds = array<i64: 1, 32>}, {transform_indices = @transform_7, window_bounds = array<i64: 8, 32>}]} {
    %c0 = arith.constant 0 : index
    %c0_0 = arith.constant 0 : index
    %0 = vector.load %arg1[%c0, %c0_0] : memref<8x32xf32, #tpu.memory_space<vmem>>, vector<8x32xf32>
    %c0_1 = arith.constant 0 : index
    %c0_2 = arith.constant 0 : index
    %1 = vector.load %arg1[%c0_1, %c0_2] : memref<8x32xf32, #tpu.memory_space<vmem>>, vector<8x32xf32>
    %c0_3 = arith.constant 0 : index
    %c0_4 = arith.constant 0 : index
    %2 = vector.load %arg2[%c0_3, %c0_4] : memref<32x32xf32, #tpu.memory_space<vmem>>, vector<32x32xf32>
    %cst = arith.constant dense<0.000000e+00> : vector<8x32xf32>
    %3 = tpu.matmul %1, %2, %cst {dimension_numbers = #tpu.dot_dimension_numbers<[1], [0], [0], [1], [0, 0, 1, 1], [], []>} : vector<8x32xf32>, vector<32x32xf32>, vector<8x32xf32> -> vector<8x32xf32>
    %c0_5 = arith.constant 0 : index
    %c0_6 = arith.constant 0 : index
    %4 = vector.load %arg3[%c0_5, %c0_6] : memref<1x32xf32, #tpu.memory_space<vmem>>, vector<1x32xf32>
    %5 = vector.broadcast %4 : vector<1x32xf32> to vector<8x32xf32>
    %6 = arith.addf %3, %5 : vector<8x32xf32>
    %cst_7 = arith.constant dense<0.000000e+00> : vector<8xf32>
    %7 = vector.multi_reduction <add>, %6, %cst_7 [1] : vector<8x32xf32> to vector<8xf32>
    %8 = vector.shape_cast %7 : vector<8xf32> to vector<8x1xf32>
    %cst_8 = arith.constant 3.200000e+01 : f32
    %9 = vector.broadcast %cst_8 : f32 to vector<8x1xf32>
    %10 = arith.divf %8, %9 : vector<8x1xf32>
    %11 = vector.broadcast %10 : vector<8x1xf32> to vector<8x32xf32>
    %12 = arith.subf %6, %11 : vector<8x32xf32>
    %13 = arith.mulf %12, %12 : vector<8x32xf32>
    %cst_9 = arith.constant dense<0.000000e+00> : vector<8xf32>
    %14 = vector.multi_reduction <add>, %13, %cst_9 [1] : vector<8x32xf32> to vector<8xf32>
    %15 = vector.shape_cast %14 : vector<8xf32> to vector<8x1xf32>
    %cst_10 = arith.constant 3.200000e+01 : f32
    %16 = vector.broadcast %cst_10 : f32 to vector<8x1xf32>
    %17 = arith.divf %15, %16 : vector<8x1xf32>
    %cst_11 = arith.constant 9.99999974E-6 : f32
    %18 = vector.broadcast %cst_11 : f32 to vector<8x1xf32>
    %19 = arith.addf %17, %18 : vector<8x1xf32>
    %20 = math.rsqrt %19 : vector<8x1xf32>
    %21 = vector.broadcast %20 : vector<8x1xf32> to vector<8x32xf32>
    %22 = arith.mulf %12, %21 : vector<8x32xf32>
    %c0_12 = arith.constant 0 : index
    %c0_13 = arith.constant 0 : index
    %23 = vector.load %arg4[%c0_12, %c0_13] : memref<1x32xf32, #tpu.memory_space<vmem>>, vector<1x32xf32>
    %24 = vector.broadcast %23 : vector<1x32xf32> to vector<8x32xf32>
    %25 = arith.mulf %22, %24 : vector<8x32xf32>
    %c0_14 = arith.constant 0 : index
    %c0_15 = arith.constant 0 : index
    %26 = vector.load %arg5[%c0_14, %c0_15] : memref<1x32xf32, #tpu.memory_space<vmem>>, vector<1x32xf32>
    %27 = vector.broadcast %26 : vector<1x32xf32> to vector<8x32xf32>
    %28 = arith.addf %25, %27 : vector<8x32xf32>
    %cst_16 = arith.constant 0.000000e+00 : f32
    %29 = vector.broadcast %cst_16 : f32 to vector<8x32xf32>
    %30 = arith.cmpf oge, %28, %29 : vector<8x32xf32>
    %cst_17 = arith.constant 0.00999999977 : f32
    %31 = vector.broadcast %cst_17 : f32 to vector<8x32xf32>
    %32 = arith.mulf %31, %28 : vector<8x32xf32>
    %33 = arith.select %30, %28, %32 : vector<8x32xi1>, vector<8x32xf32>
    %c0_18 = arith.constant 0 : index
    %c0_19 = arith.constant 0 : index
    %34 = vector.load %arg6[%c0_18, %c0_19] : memref<32x32xf32, #tpu.memory_space<vmem>>, vector<32x32xf32>
    %cst_20 = arith.constant dense<0.000000e+00> : vector<8x32xf32>
    %35 = tpu.matmul %33, %34, %cst_20 {dimension_numbers = #tpu.dot_dimension_numbers<[1], [0], [0], [1], [0, 0, 1, 1], [], []>} : vector<8x32xf32>, vector<32x32xf32>, vector<8x32xf32> -> vector<8x32xf32>
    %c0_21 = arith.constant 0 : index
    %c0_22 = arith.constant 0 : index
    %36 = vector.load %arg7[%c0_21, %c0_22] : memref<1x32xf32, #tpu.memory_space<vmem>>, vector<1x32xf32>
    %37 = vector.broadcast %36 : vector<1x32xf32> to vector<8x32xf32>
    %38 = arith.addf %35, %37 : vector<8x32xf32>
    %39 = arith.addf %0, %38 : vector<8x32xf32>
    %c0_23 = arith.constant 0 : index
    %c0_24 = arith.constant 0 : index
    %40 = vector.load %arg8[%c0_23, %c0_24] : memref<8x32xf32, #tpu.memory_space<vmem>>, vector<8x32xf32>
    tpu.vector_store %arg8[%c0_23, %c0_24], %39 {strides = array<i32>} : memref<8x32xf32, #tpu.memory_space<vmem>>, vector<8x32xf32>,
    return
  }
  func.func @transform_0(%arg0: i32) -> (i32, i32) {
    %c0_i32 = arith.constant 0 : i32
    %c0_i32_0 = arith.constant 0 : i32
    return %arg0, %c0_i32 : i32, i32
  }
  func.func @transform_1(%arg0: i32) -> (i32, i32) {
    %c0_i32 = arith.constant 0 : i32
    %c0_i32_0 = arith.constant 0 : i32
    %c0_i32_1 = arith.constant 0 : i32
    return %c0_i32, %c0_i32_0 : i32, i32
  }
  func.func @transform_2(%arg0: i32) -> (i32, i32) {
    %c0_i32 = arith.constant 0 : i32
    %c0_i32_0 = arith.constant 0 : i32
    %c0_i32_1 = arith.constant 0 : i32
    return %c0_i32, %c0_i32_0 : i32, i32
  }
  func.func @transform_3(%arg0: i32) -> (i32, i32) {
    %c0_i32 = arith.constant 0 : i32
    %c0_i32_0 = arith.constant 0 : i32
    %c0_i32_1 = arith.constant 0 : i32
    return %c0_i32, %c0_i32_0 : i32, i32
  }
  func.func @transform_4(%arg0: i32) -> (i32, i32) {
    %c0_i32 = arith.constant 0 : i32
    %c0_i32_0 = arith.constant 0 : i32
    %c0_i32_1 = arith.constant 0 : i32
    return %c0_i32, %c0_i32_0 : i32, i32
  }
  func.func @transform_5(%arg0: i32) -> (i32, i32) {
    %c0_i32 = arith.constant 0 : i32
    %c0_i32_0 = arith.constant 0 : i32
    %c0_i32_1 = arith.constant 0 : i32
    return %c0_i32, %c0_i32_0 : i32, i32
  }
  func.func @transform_6(%arg0: i32) -> (i32, i32) {
    %c0_i32 = arith.constant 0 : i32
    %c0_i32_0 = arith.constant 0 : i32
    %c0_i32_1 = arith.constant 0 : i32
    return %c0_i32, %c0_i32_0 : i32, i32
  }
  func.func @transform_7(%arg0: i32) -> (i32, i32) {
    %c0_i32 = arith.constant 0 : i32
    %c0_i32_0 = arith.constant 0 : i32
    return %arg0, %c0_i32 : i32, i32
  }
}

module attributes {stable_mosaic.version = 11 : i64} {
  func.func @residual_block_kernel(%arg0: i32, %arg1: memref<8x32xf32, #tpu.memory_space<vmem>>, %arg2: memref<32x32xf32, #tpu.memory_space<vmem>>, %arg3: memref<1x32xf32, #tpu.memory_space<vmem>>, %arg4: memref<1x32xf32, #tpu.memory_space<vmem>>, %arg5: memref<1x32xf32, #tpu.memory_space<vmem>>, %arg6: memref<32x32xf32, #tpu.memory_space<vmem>>, %arg7: memref<1x32xf32, #tpu.memory_space<vmem>>, %arg8: memref<8x32xf32, #tpu.memory_space<vmem>>) attributes {dimension_semantics = [#tpu.dimension_semantics<parallel>], iteration_bounds = array<i64: 1>, scalar_prefetch = 0 : i64, scratch_operands = 0 : i64, tpu.core_type = #tpu.core_type<tc>, window_params = [{transform_indices = @transform_0, window_bounds = array<i64: 8, 32>}, {pipeline_mode = #tpu.pipeline_mode<synchronous>, transform_indices = @transform_1, window_bounds = array<i64: 32, 32>}, {pipeline_mode = #tpu.pipeline_mode<synchronous>, transform_indices = @transform_2, window_bounds = array<i64: 1, 32>}, {pipeline_mode = #tpu.pipeline_mode<synchronous>, transform_indices = @transform_3, window_bounds = array<i64: 1, 32>}, {pipeline_mode = #tpu.pipeline_mode<synchronous>, transform_indices = @transform_4, window_bounds = array<i64: 1, 32>}, {pipeline_mode = #tpu.pipeline_mode<synchronous>, transform_indices = @transform_5, window_bounds = array<i64: 32, 32>}, {pipeline_mode = #tpu.pipeline_mode<synchronous>, transform_indices = @transform_6, window_bounds = array<i64: 1, 32>}, {transform_indices = @transform_7, window_bounds = array<i64: 8, 32>}]} {
    %c0 = arith.constant 0 : index
    %c0_0 = arith.constant 0 : index
    %0 = vector.load %arg1[%c0, %c0_0] : memref<8x32xf32, #tpu.memory_space<vmem>>, vector<8x32xf32>
    %c0_1 = arith.constant 0 : index
    %c0_2 = arith.constant 0 : index
    %1 = vector.load %arg1[%c0_1, %c0_2] : memref<8x32xf32, #tpu.memory_space<vmem>>, vector<8x32xf32>
    %c0_3 = arith.constant 0 : index
    %c0_4 = arith.constant 0 : index
    %2 = vector.load %arg2[%c0_3, %c0_4] : memref<32x32xf32, #tpu.memory_space<vmem>>, vector<32x32xf32>
    %cst = arith.constant dense<0.000000e+00> : vector<8x32xf32>
    %3 = tpu.matmul %1, %2, %cst {dimension_numbers = #tpu.dot_dimension_numbers<[1], [0], [0], [1], [0, 0, 1, 1], [], []>} : vector<8x32xf32>, vector<32x32xf32>, vector<8x32xf32> -> vector<8x32xf32>
    %c0_5 = arith.constant 0 : index
    %c0_6 = arith.constant 0 : index
    %4 = vector.load %arg3[%c0_5, %c0_6] : memref<1x32xf32, #tpu.memory_space<vmem>>, vector<1x32xf32>
    %5 = vector.broadcast %4 : vector<1x32xf32> to vector<8x32xf32>
    %6 = arith.addf %3, %5 : vector<8x32xf32>
    %cst_7 = arith.constant dense<0.000000e+00> : vector<8xf32>
    %7 = vector.multi_reduction <add>, %6, %cst_7 [1] : vector<8x32xf32> to vector<8xf32>
    %8 = vector.shape_cast %7 : vector<8xf32> to vector<8x1xf32>
    %cst_8 = arith.constant 3.200000e+01 : f32
    %9 = vector.broadcast %cst_8 : f32 to vector<8x1xf32>
    %10 = arith.divf %8, %9 : vector<8x1xf32>
    %11 = vector.broadcast %10 : vector<8x1xf32> to vector<8x32xf32>
    %12 = arith.subf %6, %11 : vector<8x32xf32>
    %13 = arith.mulf %12, %12 : vector<8x32xf32>
    %cst_9 = arith.constant dense<0.000000e+00> : vector<8xf32>
    %14 = vector.multi_reduction <add>, %13, %cst_9 [1] : vector<8x32xf32> to vector<8xf32>
    %15 = vector.shape_cast %14 : vector<8xf32> to vector<8x1xf32>
    %cst_10 = arith.constant 3.200000e+01 : f32
    %16 = vector.broadcast %cst_10 : f32 to vector<8x1xf32>
    %17 = arith.divf %15, %16 : vector<8x1xf32>
    %cst_11 = arith.constant 9.99999974E-6 : f32
    %18 = vector.broadcast %cst_11 : f32 to vector<8x1xf32>
    %19 = arith.addf %17, %18 : vector<8x1xf32>
    %20 = math.rsqrt %19 : vector<8x1xf32>
    %21 = vector.broadcast %20 : vector<8x1xf32> to vector<8x32xf32>
    %22 = arith.mulf %12, %21 : vector<8x32xf32>
    %c0_12 = arith.constant 0 : index
    %c0_13 = arith.constant 0 : index
    %23 = vector.load %arg4[%c0_12, %c0_13] : memref<1x32xf32, #tpu.memory_space<vmem>>, vector<1x32xf32>
    %24 = vector.broadcast %23 : vector<1x32xf32> to vector<8x32xf32>
    %25 = arith.mulf %22, %24 : vector<8x32xf32>
    %c0_14 = arith.constant 0 : index
    %c0_15 = arith.constant 0 : index
    %26 = vector.load %arg5[%c0_14, %c0_15] : memref<1x32xf32, #tpu.memory_space<vmem>>, vector<1x32xf32>
    %27 = vector.broadcast %26 : vector<1x32xf32> to vector<8x32xf32>
    %28 = arith.addf %25, %27 : vector<8x32xf32>
    %cst_16 = arith.constant 0.000000e+00 : f32
    %29 = vector.broadcast %cst_16 : f32 to vector<8x32xf32>
    %30 = arith.cmpf oge, %28, %29 : vector<8x32xf32>
    %cst_17 = arith.constant 0.00999999977 : f32
    %31 = vector.broadcast %cst_17 : f32 to vector<8x32xf32>
    %32 = arith.mulf %31, %28 : vector<8x32xf32>
    %33 = arith.select %30, %28, %32 : vector<8x32xi1>, vector<8x32xf32>
    %c0_18 = arith.constant 0 : index
    %c0_19 = arith.constant 0 : index
    %34 = vector.load %arg6[%c0_18, %c0_19] : memref<32x32xf32, #tpu.memory_space<vmem>>, vector<32x32xf32>
    %cst_20 = arith.constant dense<0.000000e+00> : vector<8x32xf32>
    %35 = tpu.matmul %33, %34, %cst_20 {dimension_numbers = #tpu.dot_dimension_numbers<[1], [0], [0], [1], [0, 0, 1, 1], [], []>} : vector<8x32xf32>, vector<32x32xf32>, vector<8x32xf32> -> vector<8x32xf32>
    %c0_21 = arith.constant 0 : index
    %c0_22 = arith.constant 0 : index
    %36 = vector.load %arg7[%c0_21, %c0_22] : memref<1x32xf32, #tpu.memory_space<vmem>>, vector<1x32xf32>
    %37 = vector.broadcast %36 : vector<1x32xf32> to vector<8x32xf32>
    %38 = arith.addf %35, %37 : vector<8x32xf32>
    %39 = arith.addf %0, %38 : vector<8x32xf32>
    %c0_23 = arith.constant 0 : index
    %c0_24 = arith.constant 0 : index
    %40 = vector.load %arg8[%c0_23, %c0_24] : memref<8x32xf32, #tpu.memory_space<vmem>>, vector<8x32xf32>
    tpu.vector_store %arg8[%c0_23, %c0_24], %39 {strides = array<i32>} : memref<8x32xf32, #tpu.memory_space<vmem>>, vector<8x32xf32>,
    return
  }
  func.func @transform_0(%arg0: i32) -> (i32, i32) {
    %c0_i32 = arith.constant 0 : i32
    %c0_i32_0 = arith.constant 0 : i32
    return %arg0, %c0_i32 : i32, i32
  }
  func.func @transform_1(%arg0: i32) -> (i32, i32) {
    %c0_i32 = arith.constant 0 : i32
    %c0_i32_0 = arith.constant 0 : i32
    %c0_i32_1 = arith.constant 0 : i32
    return %c0_i32, %c0_i32_0 : i32, i32
  }
  func.func @transform_2(%arg0: i32) -> (i32, i32) {
    %c0_i32 = arith.constant 0 : i32
    %c0_i32_0 = arith.constant 0 : i32
    %c0_i32_1 = arith.constant 0 : i32
    return %c0_i32, %c0_i32_0 : i32, i32
  }
  func.func @transform_3(%arg0: i32) -> (i32, i32) {
    %c0_i32 = arith.constant 0 : i32
    %c0_i32_0 = arith.constant 0 : i32
    %c0_i32_1 = arith.constant 0 : i32
    return %c0_i32, %c0_i32_0 : i32, i32
  }
  func.func @transform_4(%arg0: i32) -> (i32, i32) {
    %c0_i32 = arith.constant 0 : i32
    %c0_i32_0 = arith.constant 0 : i32
    %c0_i32_1 = arith.constant 0 : i32
    return %c0_i32, %c0_i32_0 : i32, i32
  }
  func.func @transform_5(%arg0: i32) -> (i32, i32) {
    %c0_i32 = arith.constant 0 : i32
    %c0_i32_0 = arith.constant 0 : i32
    %c0_i32_1 = arith.constant 0 : i32
    return %c0_i32, %c0_i32_0 : i32, i32
  }
  func.func @transform_6(%arg0: i32) -> (i32, i32) {
    %c0_i32 = arith.constant 0 : i32
    %c0_i32_0 = arith.constant 0 : i32
    %c0_i32_1 = arith.constant 0 : i32
    return %c0_i32, %c0_i32_0 : i32, i32
  }
  func.func @transform_7(%arg0: i32) -> (i32, i32) {
    %c0_i32 = arith.constant 0 : i32
    %c0_i32_0 = arith.constant 0 : i32
    return %arg0, %c0_i32 : i32, i32
  }
}

</mosaic_0001>

<bundles_post_ra>
// kernel: tpu_custom_call.1
= control target key start
LH: loop header
LB: loop body
LE: loop exit
PB: predicated region body
PF: predicated region fallthrough
CT: control target
= control target key end

     0   :  { %12 = vsyncpa [#allocation3], 0  ;;  %s562_s0 = inlined_call_operand.hbm [shape: f32[8,32], index: 0, kind: input, shape index: {}]   ;;  %s563_s1 = inlined_call_operand.hbm [shape: f32[32,32], index: 1, kind: input, shape index: {}]   ;;  %s564_s2 = inlined_call_operand.vmem [shape: f32[1,32], index: 2, kind: input, shape index: {}]   ;;  %s565_s3 = inlined_call_operand.vmem [shape: f32[1,32], index: 3, kind: input, shape index: {}]   ;;  %s566_s4 = inlined_call_operand.vmem [shape: f32[1,32], index: 4, kind: input, shape index: {}]   ;;  %s567_s5 = inlined_call_operand.hbm [shape: f32[32,32], index: 5, kind: input, shape index: {}]   ;;  %s568_s6 = inlined_call_operand.vmem [shape: f32[1,32], index: 6, kind: input, shape index: {}]   ;;  %s569_s7 = inlined_call_operand.hbm [shape: f32[8,32], index: 7, kind: output, shape index: {}]  }
   0x1   :  { %13 = vsyncpa [#allocation6], 0 }
   0x2   :  { %14 = vsyncpa [#allocation4], 0  ;;  %s442_s24 = smov [#allocation5]   ;;  %s348_s28 = scalar_lea.hbm %s563_s1, 512 }
   0x3   :  { %s30_s25 = sshll.u32 %s442_s24, 4  ;;  %p349_p0 = scmp.ne.s32.totalorder %s563_s1, %s348_s28  ;;  %s31_s25 = int_to_ptr.vmem [resolvable:$true] %s30_s25 }
   0x4   :  { %p352_p1 = scmp.lt.u32.totalorder %s348_s28, %s563_s1 }
   0x6   :  { %p354_p2 = pnand %p352_p1, %p349_p0 }
   0x8   :  { %357 = shalt.err (!%p354_p2)
}
   0x9   :  { %s358_s10 = scalar_lea.vmem %s31_s25, 512  ;;  %p363_p4 = scmp.lt.s32.totalorder %s31_s25, %s31_s25 }
   0xa   :  { %p359_p3 = scmp.ne.s32.totalorder %s31_s25, %s358_s10  ;;  %p364_p5 = scmp.lt.s32.totalorder %s358_s10, %s358_s10 }
   0xc   :  { %p365_p6 = por %p364_p5, %p363_p4 }
   0xe   :  { %p366_p7 = pnand %p365_p6, %p359_p3 }
  0x10   :  { %369 = shalt.err (!%p366_p7)
}
  0x11   :  { %s443_s11 = smov 128   ;;  %s444_s12 = smov 8  }
  0x12   :  { %36 = dma.hbm_to_vmem [thread:$0]  %s563_s1, 512, %s31_s25, [#allocation6], %s443_s11, %s443_s11, %s444_s12  }
  0x13   :  { %s445_s15 = smov [#allocation2]   ;;  %s446_s17 = smov [#allocation7]  }
  0x14   :  { %s21_s16 = sshll.u32 %s445_s15, 4  ;;  %s48_s18 = sshll.u32 %s446_s17, 4  ;;  %s22_s16 = int_to_ptr.vmem [resolvable:$true] %s21_s16  ;;  %s49_s18 = int_to_ptr.vmem [resolvable:$true] %s48_s18 }
  0x15   :  { %s370_s21 = scalar_lea.hbm %s562_s0, 128 }
  0x16   :  { %p371_p8 = scmp.ne.s32.totalorder %s562_s0, %s370_s21  ;;  %p374_p9 = scmp.lt.u32.totalorder %s370_s21, %s562_s0 }
  0x18   :  { %p376_p10 = pnand %p374_p9, %p371_p8 }
  0x1a   :  { %379 = shalt.err (!%p376_p10)
}
  0x1b   :  { %s380_s1 = scalar_lea.vmem %s22_s16, 128  ;;  %p385_p12 = scmp.lt.s32.totalorder %s22_s16, %s22_s16 }
  0x1c   :  { %p381_p11 = scmp.ne.s32.totalorder %s22_s16, %s380_s1  ;;  %p386_p13 = scmp.lt.s32.totalorder %s380_s1, %s380_s1 }
  0x1e   :  { %p387_p0 = por %p386_p13, %p385_p12 }
  0x20   :  { %p388_p1 = pnand %p387_p0, %p381_p11 }
  0x22   :  { %391 = shalt.err (!%p388_p1)
}
  0x23   :  { %24 = dma.hbm_to_vmem [thread:$0]  %s562_s0, 128, %s22_s16, [#allocation3]  }
  0x24   :  { %s392_s30 = scalar_lea.hbm %s567_s5, 512 }
  0x25   :  { %p393_p2 = scmp.ne.s32.totalorder %s567_s5, %s392_s30  ;;  %p396_p3 = scmp.lt.u32.totalorder %s392_s30, %s567_s5 }
  0x27   :  { %p398_p4 = pnand %p396_p3, %p393_p2 }
  0x29   :  { %401 = shalt.err (!%p398_p4)
}
  0x2a   :  { %s402_s14 = scalar_lea.vmem %s49_s18, 512  ;;  %p407_p6 = scmp.lt.s32.totalorder %s49_s18, %s49_s18 }
  0x2b   :  { %p403_p5 = scmp.ne.s32.totalorder %s49_s18, %s402_s14  ;;  %p408_p7 = scmp.lt.s32.totalorder %s402_s14, %s402_s14 }
  0x2d   :  { %p409_p8 = por %p408_p7, %p407_p6 }
  0x2f   :  { %p410_p9 = pnand %p409_p8, %p403_p5 }
  0x31   :  { %413 = shalt.err (!%p410_p9)
}
  0x32   :  { %54 = dma.hbm_to_vmem [thread:$0]  %s567_s5, 512, %s49_s18, [#allocation6], %s443_s11, %s443_s11, %s444_s12  }
  0x33   :  { %436 = dma.done.wait [#allocation3], 128  }
  0x34   :  { %437 = vsyncadd [#allocation3], 4294967168 }
  0x35   :  { %438 = dma.done.wait [#allocation6], 1024  }
  0x36   :  { %439 = vsyncadd [#allocation6], 4294966272  ;;  %v447_v0 = vmov 0.0|0.0   ;;  %vm448_vm0 = vmmov 0   ;;  %v449_v1 = vmov 0.0   ;;  %v67_v2 = vld [vmem:[#allocation5] sm:$0xff] }
  0x37   :  { %325 = vmatprep.subr.bf16.mxu0 %v447_v0  ;;  %311 = vmatprep.mubr.msk.f32.mxu0 %vm448_vm0, %v449_v1  ;;  %v68_v3 = vld [vmem:[#allocation5 + $0x8] sm:$0xff]  ;;  %v69_v4 = vld [vmem:[#allocation5 + $0x10] sm:$0xff]  ;;  %v70_v6 = vld [vmem:[#allocation5 + $0x18] sm:$0xff]  ;;  %vm78_vm1 = vcmask 261120   ;;  %s450_s20 = smov [#allocation8]  }
  0x38   :  { %331 = vmatprep.subr.bf16.mxu1 %v447_v0  ;;  %322 = vmatprep.mubr.msk.f32.mxu1 %vm448_vm0, %v449_v1  ;;  %v326_v5 = vpack.c.bf16 %v68_v3, %v67_v2  ;;  %v329_v7 = vpack.c.bf16 %v70_v6, %v69_v4  ;;  %v66_v8 = vld [vmem:[#allocation2] sm:$0xff]  ;;  %v185_v19 = vld [vmem:[#allocation7] sm:$0xff]  ;;  %v186_v20 = vld [vmem:[#allocation7 + $0x8] sm:$0xff]  ;;  %s277_s21 = sshll.u32 %s450_s20, 4  ;;  %s278_s21 = int_to_ptr.vmem [resolvable:$true] %s277_s21 }
  0x39   :  { %v287_v9 = vld [vmem:[%s564_s2] ss:$0 sm:$0xff]  ;;  %v332_v21 = vpack.c.bf16 %v186_v20, %v185_v19  ;;  %v187_v22 = vld [vmem:[#allocation7 + $0x10] sm:$0xff]  ;;  %p419_p11 = scmp.lt.s32.totalorder %s278_s21, %s278_s21 }
  0x3a   :  { %327 = vmatpush3.bf16.msra.mxu0 %v326_v5  ;;  %v188_v23 = vld [vmem:[#allocation7 + $0x18] sm:$0xff] }
  0x3b   :  { %328 = vmatprep.subr.bf16.mxu0 %v447_v0  ;;  %333 = vmatpush3.bf16.msra.mxu1 %v332_v21  ;;  %v335_v24 = vpack.c.bf16 %v188_v23, %v187_v22  ;;  %v289_v29 = vld [vmem:[%s565_s3] ss:$0 sm:$0xff]  ;;  %s414_s3 = scalar_lea.vmem %s278_s21, 128 }
  0x3c   :  { %334 = vmatprep.subr.bf16.mxu1 %v447_v0  ;;  %v290_v31 = vld [vmem:[%s566_s4] ss:$0 sm:$0xff]  ;;  %p415_p10 = scmp.ne.s32.totalorder %s278_s21, %s414_s3  ;;  %p420_p12 = scmp.lt.s32.totalorder %s414_s3, %s414_s3 }
  0x3d   :  { %v291_v36 = vld [vmem:[%s568_s6] ss:$0 sm:$0xff] }
  0x3e   :  { %330 = vmatpush3.bf16.msra.mxu0 %v329_v7  ;;  %p421_p13 = por %p420_p12, %p419_p11 }
  0x3f   :  { %336 = vmatpush3.bf16.msra.mxu1 %v335_v24 }
  0x40   :  { %p422_p0 = pnand %p421_p13, %p415_p10 }
  0x41   :  { %312 = vmatmul.mubr.msk.f32.vlgmr.msra.gmra.mrb[0].mxu0 %vm78_vm1, %v66_v8 }
 0x114   :  { %v148_v10 = vpop.f32.mrb[0].mxu0 }
 0x115   :  { %v149_v11 = vadd.f32 %v287_v9, %v148_v10  ;;  %v313_v12 = vpop.f32.mrb[1].mxu0 }
 0x117   :  { %v152_v13 = vsel %vm78_vm1, %v149_v11, 0.0 }
 0x118   :  { %153 = vadd.xlane.f32.xlu0 %v152_v13 }
 0x1a5   :  { %v154_v14 = vpop.xlane.xlu0 %153 }
 0x1a6   :  { %v156_v15 = vmul.f32 0.03125, %v154_v14 }
 0x1a8   :  { %v157_v16 = vsub.f32 %v149_v11, %v156_v15 }
 0x1aa   :  { %v158_v17 = vmul.f32 %v157_v16, %v157_v16 }
 0x1ac   :  { %v159_v18 = vsel %vm78_vm1, %v158_v17, 0.0 }
 0x1ad   :  { %160 = vadd.xlane.f32.xlu0 %v159_v18 }
 0x23a   :  { %v161_v25 = vpop.xlane.xlu0 %160 }
 0x23b   :  { %v162_v26 = vmul.f32 0.03125, %v161_v25 }
 0x23d   :  { %v163_v27 = vadd.f32 1e-05, %v162_v26 }
 0x23f   :  { %346 = vrsqrt.f32 %v163_v27 }
 0x249   :  { %v347_v28 = vpop.eup %346 }
 0x24a   :  { %v165_v30 = vmul.f32 %v347_v28, %v157_v16 }
 0x24c   :  { %v173_v32 = vmul.f32 %v289_v29, %v165_v30 }
 0x24e   :  { %v181_v33 = vadd.f32 %v290_v31, %v173_v32 }
 0x250   :  { %vm182_vm2 = vcmp.ge.f32.partialorder %v181_v33, 0.0  ;;  %v183_v34 = vmul.f32 0.01, %v181_v33 }
 0x252   :  { %v184_v35 = vsel %vm182_vm2, %v181_v33, %v183_v34 }
 0x253   :  { %323 = vmatmul.mubr.msk.f32.vlgmr.msra.gmra.mrb[0].mxu1 %vm78_vm1, %v184_v35 }
 0x326   :  { %v265_v37 = vpop.f32.mrb[0].mxu1 }
 0x327   :  { %v266_v38 = vadd.f32 %v291_v36, %v265_v37  ;;  %v324_v39 = vpop.f32.mrb[1].mxu1 }
 0x329   :  { %v269_v40 = vadd.f32 %v266_v38, %v66_v8 }
 0x32b   :  { %270 = vst.msk [vmem:[#allocation8] sm:$0xff] %vm78_vm1, %v269_v40 }
 0x32c   :  { %425 = shalt.err (!%p422_p0)
}
 0x32d   :  { %s426_s6 = scalar_lea.hbm %s569_s7, 128 }
 0x32e   :  { %p427_p1 = scmp.ne.s32.totalorder %s569_s7, %s426_s6  ;;  %p430_p2 = scmp.lt.u32.totalorder %s426_s6, %s569_s7 }
 0x330   :  { %p432_p3 = pnand %p430_p2, %p427_p1 }
 0x332   :  { %435 = shalt.err (!%p432_p3)
}
 0x333   :  { %280 = dma.vmem_to_hbm [thread:$0]  %s278_s21, 128, %s569_s7, [#allocation4]  }
 0x334   :  { %440 = dma.done.wait [#allocation4], 128  }
 0x335   :  { %441 = vsyncadd [#allocation4], 4294967168 }
 0x336   :  { %284 = vsyncpa [#allocation3], 1 }
 0x337   :  { %285 = vsyncpa [#allocation6], 1 }
 0x338   :  { %286 = vsyncpa [#allocation4], 1 }

// kernel: tpu_custom_call.1
= control target key start
LH: loop header
LB: loop body
LE: loop exit
PB: predicated region body
PF: predicated region fallthrough
CT: control target
= control target key end

     0   :  { %12 = vsyncpa [#allocation3], 0  ;;  %s562_s0 = inlined_call_operand.hbm [shape: f32[8,32], index: 0, kind: input, shape index: {}]   ;;  %s563_s1 = inlined_call_operand.hbm [shape: f32[32,32], index: 1, kind: input, shape index: {}]   ;;  %s564_s2 = inlined_call_operand.vmem [shape: f32[1,32], index: 2, kind: input, shape index: {}]   ;;  %s565_s3 = inlined_call_operand.vmem [shape: f32[1,32], index: 3, kind: input, shape index: {}]   ;;  %s566_s4 = inlined_call_operand.vmem [shape: f32[1,32], index: 4, kind: input, shape index: {}]   ;;  %s567_s5 = inlined_call_operand.hbm [shape: f32[32,32], index: 5, kind: input, shape index: {}]   ;;  %s568_s6 = inlined_call_operand.vmem [shape: f32[1,32], index: 6, kind: input, shape index: {}]   ;;  %s569_s7 = inlined_call_operand.hbm [shape: f32[8,32], index: 7, kind: output, shape index: {}]  }
   0x1   :  { %13 = vsyncpa [#allocation6], 0 }
   0x2   :  { %14 = vsyncpa [#allocation4], 0  ;;  %s442_s24 = smov [#allocation5]   ;;  %s348_s28 = scalar_lea.hbm %s563_s1, 512 }
   0x3   :  { %s30_s25 = sshll.u32 %s442_s24, 4  ;;  %p349_p0 = scmp.ne.s32.totalorder %s563_s1, %s348_s28  ;;  %s31_s25 = int_to_ptr.vmem [resolvable:$true] %s30_s25 }
   0x4   :  { %p352_p1 = scmp.lt.u32.totalorder %s348_s28, %s563_s1 }
   0x6   :  { %p354_p2 = pnand %p352_p1, %p349_p0 }
   0x8   :  { %357 = shalt.err (!%p354_p2)
}
   0x9   :  { %s358_s10 = scalar_lea.vmem %s31_s25, 512  ;;  %p363_p4 = scmp.lt.s32.totalorder %s31_s25, %s31_s25 }
   0xa   :  { %p359_p3 = scmp.ne.s32.totalorder %s31_s25, %s358_s10  ;;  %p364_p5 = scmp.lt.s32.totalorder %s358_s10, %s358_s10 }
   0xc   :  { %p365_p6 = por %p364_p5, %p363_p4 }
   0xe   :  { %p366_p7 = pnand %p365_p6, %p359_p3 }
  0x10   :  { %369 = shalt.err (!%p366_p7)
}
  0x11   :  { %s443_s11 = smov 128   ;;  %s444_s12 = smov 8  }
  0x12   :  { %36 = dma.hbm_to_vmem [thread:$0]  %s563_s1, 512, %s31_s25, [#allocation6], %s443_s11, %s443_s11, %s444_s12  }
  0x13   :  { %s445_s15 = smov [#allocation2]   ;;  %s446_s17 = smov [#allocation7]  }
  0x14   :  { %s21_s16 = sshll.u32 %s445_s15, 4  ;;  %s48_s18 = sshll.u32 %s446_s17, 4  ;;  %s22_s16 = int_to_ptr.vmem [resolvable:$true] %s21_s16  ;;  %s49_s18 = int_to_ptr.vmem [resolvable:$true] %s48_s18 }
  0x15   :  { %s370_s21 = scalar_lea.hbm %s562_s0, 128 }
  0x16   :  { %p371_p8 = scmp.ne.s32.totalorder %s562_s0, %s370_s21  ;;  %p374_p9 = scmp.lt.u32.totalorder %s370_s21, %s562_s0 }
  0x18   :  { %p376_p10 = pnand %p374_p9, %p371_p8 }
  0x1a   :  { %379 = shalt.err (!%p376_p10)
}
  0x1b   :  { %s380_s1 = scalar_lea.vmem %s22_s16, 128  ;;  %p385_p12 = scmp.lt.s32.totalorder %s22_s16, %s22_s16 }
  0x1c   :  { %p381_p11 = scmp.ne.s32.totalorder %s22_s16, %s380_s1  ;;  %p386_p13 = scmp.lt.s32.totalorder %s380_s1, %s380_s1 }
  0x1e   :  { %p387_p0 = por %p386_p13, %p385_p12 }
  0x20   :  { %p388_p1 = pnand %p387_p0, %p381_p11 }
  0x22   :  { %391 = shalt.err (!%p388_p1)
}
  0x23   :  { %24 = dma.hbm_to_vmem [thread:$0]  %s562_s0, 128, %s22_s16, [#allocation3]  }
  0x24   :  { %s392_s30 = scalar_lea.hbm %s567_s5, 512 }
  0x25   :  { %p393_p2 = scmp.ne.s32.totalorder %s567_s5, %s392_s30  ;;  %p396_p3 = scmp.lt.u32.totalorder %s392_s30, %s567_s5 }
  0x27   :  { %p398_p4 = pnand %p396_p3, %p393_p2 }
  0x29   :  { %401 = shalt.err (!%p398_p4)
}
  0x2a   :  { %s402_s14 = scalar_lea.vmem %s49_s18, 512  ;;  %p407_p6 = scmp.lt.s32.totalorder %s49_s18, %s49_s18 }
  0x2b   :  { %p403_p5 = scmp.ne.s32.totalorder %s49_s18, %s402_s14  ;;  %p408_p7 = scmp.lt.s32.totalorder %s402_s14, %s402_s14 }
  0x2d   :  { %p409_p8 = por %p408_p7, %p407_p6 }
  0x2f   :  { %p410_p9 = pnand %p409_p8, %p403_p5 }
  0x31   :  { %413 = shalt.err (!%p410_p9)
}
  0x32   :  { %54 = dma.hbm_to_vmem [thread:$0]  %s567_s5, 512, %s49_s18, [#allocation6], %s443_s11, %s443_s11, %s444_s12  }
  0x33   :  { %436 = dma.done.wait [#allocation3], 128  }
  0x34   :  { %437 = vsyncadd [#allocation3], 4294967168 }
  0x35   :  { %438 = dma.done.wait [#allocation6], 1024  }
  0x36   :  { %439 = vsyncadd [#allocation6], 4294966272  ;;  %v447_v0 = vmov 0.0|0.0   ;;  %vm448_vm0 = vmmov 0   ;;  %v449_v1 = vmov 0.0   ;;  %v67_v2 = vld [vmem:[#allocation5] sm:$0xff] }
  0x37   :  { %325 = vmatprep.subr.bf16.mxu0 %v447_v0  ;;  %311 = vmatprep.mubr.msk.f32.mxu0 %vm448_vm0, %v449_v1  ;;  %v68_v3 = vld [vmem:[#allocation5 + $0x8] sm:$0xff]  ;;  %v69_v4 = vld [vmem:[#allocation5 + $0x10] sm:$0xff]  ;;  %v70_v6 = vld [vmem:[#allocation5 + $0x18] sm:$0xff]  ;;  %vm78_vm1 = vcmask 261120   ;;  %s450_s20 = smov [#allocation8]  }
  0x38   :  { %331 = vmatprep.subr.bf16.mxu1 %v447_v0  ;;  %322 = vmatprep.mubr.msk.f32.mxu1 %vm448_vm0, %v449_v1  ;;  %v326_v5 = vpack.c.bf16 %v68_v3, %v67_v2  ;;  %v329_v7 = vpack.c.bf16 %v70_v6, %v69_v4  ;;  %v66_v8 = vld [vmem:[#allocation2] sm:$0xff]  ;;  %v185_v19 = vld [vmem:[#allocation7] sm:$0xff]  ;;  %v186_v20 = vld [vmem:[#allocation7 + $0x8] sm:$0xff]  ;;  %s277_s21 = sshll.u32 %s450_s20, 4  ;;  %s278_s21 = int_to_ptr.vmem [resolvable:$true] %s277_s21 }
  0x39   :  { %v287_v9 = vld [vmem:[%s564_s2] ss:$0 sm:$0xff]  ;;  %v332_v21 = vpack.c.bf16 %v186_v20, %v185_v19  ;;  %v187_v22 = vld [vmem:[#allocation7 + $0x10] sm:$0xff]  ;;  %p419_p11 = scmp.lt.s32.totalorder %s278_s21, %s278_s21 }
  0x3a   :  { %327 = vmatpush3.bf16.msra.mxu0 %v326_v5  ;;  %v188_v23 = vld [vmem:[#allocation7 + $0x18] sm:$0xff] }
  0x3b   :  { %328 = vmatprep.subr.bf16.mxu0 %v447_v0  ;;  %333 = vmatpush3.bf16.msra.mxu1 %v332_v21  ;;  %v335_v24 = vpack.c.bf16 %v188_v23, %v187_v22  ;;  %v289_v29 = vld [vmem:[%s565_s3] ss:$0 sm:$0xff]  ;;  %s414_s3 = scalar_lea.vmem %s278_s21, 128 }
  0x3c   :  { %334 = vmatprep.subr.bf16.mxu1 %v447_v0  ;;  %v290_v31 = vld [vmem:[%s566_s4] ss:$0 sm:$0xff]  ;;  %p415_p10 = scmp.ne.s32.totalorder %s278_s21, %s414_s3  ;;  %p420_p12 = scmp.lt.s32.totalorder %s414_s3, %s414_s3 }
  0x3d   :  { %v291_v36 = vld [vmem:[%s568_s6] ss:$0 sm:$0xff] }
  0x3e   :  { %330 = vmatpush3.bf16.msra.mxu0 %v329_v7  ;;  %p421_p13 = por %p420_p12, %p419_p11 }
  0x3f   :  { %336 = vmatpush3.bf16.msra.mxu1 %v335_v24 }
  0x40   :  { %p422_p0 = pnand %p421_p13, %p415_p10 }
  0x41   :  { %312 = vmatmul.mubr.msk.f32.vlgmr.msra.gmra.mrb[0].mxu0 %vm78_vm1, %v66_v8 }
 0x114   :  { %v148_v10 = vpop.f32.mrb[0].mxu0 }
 0x115   :  { %v149_v11 = vadd.f32 %v287_v9, %v148_v10  ;;  %v313_v12 = vpop.f32.mrb[1].mxu0 }
 0x117   :  { %v152_v13 = vsel %vm78_vm1, %v149_v11, 0.0 }
 0x118   :  { %153 = vadd.xlane.f32.xlu0 %v152_v13 }
 0x1a5   :  { %v154_v14 = vpop.xlane.xlu0 %153 }
 0x1a6   :  { %v156_v15 = vmul.f32 0.03125, %v154_v14 }
 0x1a8   :  { %v157_v16 = vsub.f32 %v149_v11, %v156_v15 }
 0x1aa   :  { %v158_v17 = vmul.f32 %v157_v16, %v157_v16 }
 0x1ac   :  { %v159_v18 = vsel %vm78_vm1, %v158_v17, 0.0 }
 0x1ad   :  { %160 = vadd.xlane.f32.xlu0 %v159_v18 }
 0x23a   :  { %v161_v25 = vpop.xlane.xlu0 %160 }
 0x23b   :  { %v162_v26 = vmul.f32 0.03125, %v161_v25 }
 0x23d   :  { %v163_v27 = vadd.f32 1e-05, %v162_v26 }
 0x23f   :  { %346 = vrsqrt.f32 %v163_v27 }
 0x249   :  { %v347_v28 = vpop.eup %346 }
 0x24a   :  { %v165_v30 = vmul.f32 %v347_v28, %v157_v16 }
 0x24c   :  { %v173_v32 = vmul.f32 %v289_v29, %v165_v30 }
 0x24e   :  { %v181_v33 = vadd.f32 %v290_v31, %v173_v32 }
 0x250   :  { %vm182_vm2 = vcmp.ge.f32.partialorder %v181_v33, 0.0  ;;  %v183_v34 = vmul.f32 0.01, %v181_v33 }
 0x252   :  { %v184_v35 = vsel %vm182_vm2, %v181_v33, %v183_v34 }
 0x253   :  { %323 = vmatmul.mubr.msk.f32.vlgmr.msra.gmra.mrb[0].mxu1 %vm78_vm1, %v184_v35 }
 0x326   :  { %v265_v37 = vpop.f32.mrb[0].mxu1 }
 0x327   :  { %v266_v38 = vadd.f32 %v291_v36, %v265_v37  ;;  %v324_v39 = vpop.f32.mrb[1].mxu1 }
 0x329   :  { %v269_v40 = vadd.f32 %v266_v38, %v66_v8 }
 0x32b   :  { %270 = vst.msk [vmem:[#allocation8] sm:$0xff] %vm78_vm1, %v269_v40 }
 0x32c   :  { %425 = shalt.err (!%p422_p0)
}
 0x32d   :  { %s426_s6 = scalar_lea.hbm %s569_s7, 128 }
 0x32e   :  { %p427_p1 = scmp.ne.s32.totalorder %s569_s7, %s426_s6  ;;  %p430_p2 = scmp.lt.u32.totalorder %s426_s6, %s569_s7 }
 0x330   :  { %p432_p3 = pnand %p430_p2, %p427_p1 }
 0x332   :  { %435 = shalt.err (!%p432_p3)
}
 0x333   :  { %280 = dma.vmem_to_hbm [thread:$0]  %s278_s21, 128, %s569_s7, [#allocation4]  }
 0x334   :  { %440 = dma.done.wait [#allocation4], 128  }
 0x335   :  { %441 = vsyncadd [#allocation4], 4294967168 }
 0x336   :  { %284 = vsyncpa [#allocation3], 1 }
 0x337   :  { %285 = vsyncpa [#allocation6], 1 }
 0x338   :  { %286 = vsyncpa [#allocation4], 1 }

</bundles_post_ra>
